<compile_context>
chip_gen: v7x
topology: tpu7x:2x2x1
jax: 0.10.0
libtpu: 0.0.40
codegen_flags: <defaults>
</compile_context>

<pallas_src>
import functools

import jax
import jax.numpy as jnp
from jax.experimental import pallas as pl
from jax.experimental.pallas import tpu as pltpu


def _avg_pool_fast_kernel(x_ref, o_ref, *, inv_s):
    # x_ref: (tb, S, th) full-seq block; o_ref: (tb, th).
    o_ref[...] = (jnp.sum(x_ref[...].astype(jnp.float32), axis=1) * inv_s
                  ).astype(o_ref.dtype)


def _avg_pool_tiled_kernel(x_ref, o_ref, acc_ref, *, inv_s, s_valid_last):
    # x_ref  : (tb, ts, th) input tile
    # o_ref  : (tb, th)     pooled output tile (same block for every S step)
    # acc_ref: (tb, th)     f32 accumulator scratch, persists across S steps
    s_idx = pl.program_id(2)
    n_s = pl.num_programs(2)

    @pl.when(s_idx == 0)
    def _():
        acc_ref[...] = jnp.zeros_like(acc_ref)

    def _accum(mask_tail):
        x = x_ref[...].astype(jnp.float32)
        if mask_tail:
            # Zero the out-of-bounds rows of the final (partial) seq tile so
            # the undefined padding never reaches the sum.
            seq_ids = jax.lax.broadcasted_iota(jnp.int32, x_ref.shape, 1)
            x = jnp.where(seq_ids < s_valid_last, x, 0.0)
        acc_ref[...] += jnp.sum(x, axis=1)

    if s_valid_last is None:                 # S % ts == 0: never mask
        _accum(False)
    else:                                    # mask only on the last S step
        pl.when(s_idx == n_s - 1)(lambda: _accum(True))
        pl.when(s_idx != n_s - 1)(lambda: _accum(False))

    @pl.when(s_idx == n_s - 1)
    def _():
        # Scale once in the epilogue with the true 1/S, then cast back.
        o_ref[...] = (acc_ref[...] * inv_s).astype(o_ref.dtype)


def avg_pooler(hidden_states, *, tb=None, ts=None, th=None,
               vmem_limit_bytes=48 * 1024 * 1024):
    """Mean over the seq axis: (B, S, H) -> (B, H)."""
    B, S, H = hidden_states.shape
    dtype = hidden_states.dtype
    itemsize = jnp.dtype(dtype).itemsize
    sublane = 32 // itemsize        # native packing: 8 f32 / 16 bf16 / 32 int8

    # Batch tile: 8 rows per block (dense sublane stores).  Batch tails are
    # handled by Pallas partial-block semantics (OOB output rows are dropped).
    if tb is None:
        tb = 8 if B >= 8 else B

    # Hidden tile: must be a multiple of 128 or equal to H.
    if th is None:
        th = H
        # v7x: ensure >= 2 "parallel" blocks so both TensorCores stream.
        if pl.cdiv(B, tb) == 1 and H % 256 == 0:
            th = H // 2
        # Split very wide H so blocks stay modest and shard well.
        while th > 2048 and th % 256 == 0:
            th //= 2
    assert H % th == 0 and (th == H or th % 128 == 0), \
        "th must divide H and be a multiple of 128 (or equal H)"

    # Seq (reduction) tile: target ~8 MiB per input block (~16 MiB when
    # double-buffered) - saturates HBM on v5e/v6e/v7x and fits 64 MiB VMEM.
    if ts is None:
        target_bytes = 8 * 1024 * 1024
        ts = target_bytes // max(1, tb * th * itemsize)
    ts = min(ts, S)
    if ts < S:
        ts = max(sublane, (ts // sublane) * sublane)

    inv_s = float(1.0 / S)          # true S; padded/masked rows add nothing
    nb = pl.cdiv(B, tb)
    nh = H // th

    if ts >= S:
        # Fast path: whole seq axis in one block -> no scratch, no S loop.
        return pl.pallas_call(
            functools.partial(_avg_pool_fast_kernel, inv_s=inv_s),
            out_shape=jax.ShapeDtypeStruct((B, H), dtype),
            grid_spec=pltpu.PrefetchScalarGridSpec(
                num_scalar_prefetch=0,
                grid=(nb, nh),
                in_specs=[pl.BlockSpec((tb, S, th), lambda b, h: (b, 0, h))],
                out_specs=pl.BlockSpec((tb, th), lambda b, h: (b, h)),
            ),
            compiler_params=pltpu.CompilerParams(
                dimension_semantics=("parallel", "parallel"),
                vmem_limit_bytes=vmem_limit_bytes,
            ),
        )(hidden_states)

    ns = pl.cdiv(S, ts)
    s_rem = S - (ns - 1) * ts
    s_valid_last = s_rem if s_rem != ts else None

    return pl.pallas_call(
        functools.partial(_avg_pool_tiled_kernel, inv_s=inv_s,
                          s_valid_last=s_valid_last),
        out_shape=jax.ShapeDtypeStruct((B, H), dtype),
        grid_spec=pltpu.PrefetchScalarGridSpec(
            num_scalar_prefetch=0,
            grid=(nb, nh, ns),
            in_specs=[pl.BlockSpec((tb, ts, th), lambda b, h, s: (b, s, h))],
            out_specs=pl.BlockSpec((tb, th), lambda b, h, s: (b, h)),
            scratch_shapes=[pltpu.VMEM((tb, th), jnp.float32)],
        ),
        compiler_params=pltpu.CompilerParams(
            dimension_semantics=("parallel", "parallel", "arbitrary"),
            vmem_limit_bytes=vmem_limit_bytes,
        ),
    )(hidden_states)


if __name__ == "__main__":
    key = jax.random.PRNGKey(0)

    # Test 1: small shapes consistent with the module (single-block fast path).
    B, S, H = 2, 8, 128
    hs = jax.random.normal(key, (B, S, H), dtype=jnp.float32)
    out = jax.block_until_ready(avg_pooler(hs))
    ref = jnp.mean(hs, axis=1)
    assert out.shape == (B, H)
    assert jnp.allclose(out, ref, atol=1e-5, rtol=1e-5)

    # Test 2: force the tiled path with a seq tail (masked last S step) and a
    # partial batch block (no padding, OOB output rows dropped).
    B2, S2, H2 = 10, 100, 256
    hs2 = jax.random.normal(jax.random.PRNGKey(1), (B2, S2, H2),
                            dtype=jnp.float32)
    out2 = jax.block_until_ready(avg_pooler(hs2, tb=8, ts=32, th=128))
    ref2 = jnp.mean(hs2, axis=1)
    assert out2.shape == (B2, H2)
    assert jnp.allclose(out2, ref2, atol=1e-5, rtol=1e-5)

    print("KERNEL_OK")
</pallas_src>

<mosaic_0001>
module attributes {stable_mosaic.version = 11 : i64} {
  func.func @_avg_pool_fast_kernel(%arg0: i32, %arg1: i32, %arg2: memref<2x8x128xf32, #tpu.memory_space<vmem>>, %arg3: memref<2x128xf32, #tpu.memory_space<vmem>>) attributes {dimension_semantics = [#tpu.dimension_semantics<parallel>, #tpu.dimension_semantics<parallel>], iteration_bounds = array<i64: 1, 1>, scalar_prefetch = 0 : i64, scratch_operands = 0 : i64, tpu.core_type = #tpu.core_type<tc>, window_params = [{transform_indices = @transform_0, window_bounds = array<i64: 2, 8, 128>}, {transform_indices = @transform_1, window_bounds = array<i64: 2, 128>}]} {
    %c0 = arith.constant 0 : index
    %c0_0 = arith.constant 0 : index
    %c0_1 = arith.constant 0 : index
    %0 = vector.load %arg2[%c0, %c0_0, %c0_1] : memref<2x8x128xf32, #tpu.memory_space<vmem>>, vector<2x8x128xf32>
    %cst = arith.constant dense<0.000000e+00> : vector<2x128xf32>
    %1 = vector.multi_reduction <add>, %0, %cst [1] : vector<2x8x128xf32> to vector<2x128xf32>
    %cst_2 = arith.constant 1.250000e-01 : f32
    %2 = vector.broadcast %cst_2 : f32 to vector<2x128xf32>
    %3 = arith.mulf %1, %2 : vector<2x128xf32>
    %c0_3 = arith.constant 0 : index
    %c0_4 = arith.constant 0 : index
    %4 = vector.load %arg3[%c0_3, %c0_4] : memref<2x128xf32, #tpu.memory_space<vmem>>, vector<2x128xf32>
    tpu.vector_store %arg3[%c0_3, %c0_4], %3 {strides = array<i32>} : memref<2x128xf32, #tpu.memory_space<vmem>>, vector<2x128xf32>,
    return
  }
  func.func @transform_0(%arg0: i32, %arg1: i32) -> (i32, i32, i32) {
    %c0_i32 = arith.constant 0 : i32
    %c0_i32_0 = arith.constant 0 : i32
    return %arg0, %c0_i32, %arg1 : i32, i32, i32
  }
  func.func @transform_1(%arg0: i32, %arg1: i32) -> (i32, i32) {
    %c0_i32 = arith.constant 0 : i32
    return %arg0, %arg1 : i32, i32
  }
}

</mosaic_0001>

<bundles_post_ra>
// kernel: tpu_custom_call.1
= control target key start
LH: loop header
LB: loop body
LE: loop exit
PB: predicated region body
PF: predicated region fallthrough
CT: control target
= control target key end

     0   :  { %6 = vsyncpa [#allocation3], 0  ;;  %s150_s0 = inlined_call_operand.hbm [shape: f32[2,8,128], index: 0, kind: input, shape index: {}]   ;;  %s151_s1 = inlined_call_operand.hbm [shape: f32[2,128], index: 1, kind: output, shape index: {}]  }
   0x1   :  { %7 = vsyncpa [#allocation4], 0  ;;  %s112_s6 = smov [#allocation2]   ;;  %s64_s10 = scalar_lea.hbm %s150_s0, 256 }
   0x2   :  { %s13_s7 = sshll.u32 %s112_s6, 4  ;;  %p65_p0 = scmp.ne.s32.totalorder %s150_s0, %s64_s10  ;;  %s14_s7 = int_to_ptr.vmem [resolvable:$true] %s13_s7 }
   0x3   :  { %p68_p1 = scmp.lt.u32.totalorder %s64_s10, %s150_s0 }
   0x5   :  { %p70_p2 = pnand %p68_p1, %p65_p0 }
   0x7   :  { %73 = shalt.err (!%p70_p2)
}
   0x8   :  { %s74_s15 = scalar_lea.vmem %s14_s7, 256  ;;  %p79_p4 = scmp.lt.s32.totalorder %s14_s7, %s14_s7 }
   0x9   :  { %p75_p3 = scmp.ne.s32.totalorder %s14_s7, %s74_s15  ;;  %p80_p5 = scmp.lt.s32.totalorder %s74_s15, %s74_s15 }
   0xb   :  { %p81_p6 = por %p80_p5, %p79_p4 }
   0xd   :  { %p82_p7 = pnand %p81_p6, %p75_p3 }
   0xf   :  { %85 = shalt.err (!%p82_p7)
}
  0x10   :  { %s113_s16 = smov 128   ;;  %s114_s17 = smov 8  }
  0x11   :  { %19 = dma.hbm_to_vmem [thread:$0]  %s150_s0, 256, %s14_s7, [#allocation3], %s113_s16, %s113_s16, %s114_s17  }
  0x12   :  { %108 = dma.done.wait [#allocation3], 256  }
  0x13   :  { %109 = vsyncadd [#allocation3], 4294967040  ;;  %v23_v0 = vld [vmem:[#allocation2] sm:$0xff]  ;;  %v24_v1 = vld [vmem:[#allocation2 + $0x8] sm:$0xff]  ;;  %s115_s20 = smov [#allocation5]   ;;  %vm41_vm0 = vcmask 1041409  }
  0x14   :  { %v25_v2 = vrot.slane %v23_v0, 4  ;;  %v31_v3 = vrot.slane %v24_v1, 4  ;;  %s51_s21 = sshll.u32 %s115_s20, 4  ;;  %s52_s21 = int_to_ptr.vmem [resolvable:$true] %s51_s21 }
  0x15   :  { %s86_s0 = scalar_lea.vmem %s52_s21, 32  ;;  %p91_p9 = scmp.lt.s32.totalorder %s52_s21, %s52_s21 }
  0x16   :  { %v26_v4 = vadd.f32 %v25_v2, %v23_v0  ;;  %v32_v5 = vadd.f32 %v31_v3, %v24_v1  ;;  %p87_p8 = scmp.ne.s32.totalorder %s52_s21, %s86_s0  ;;  %p92_p10 = scmp.lt.s32.totalorder %s86_s0, %s86_s0 }
  0x18   :  { %v27_v6 = vrot.slane %v26_v4, 2  ;;  %v33_v7 = vrot.slane %v32_v5, 2  ;;  %p93_p11 = por %p92_p10, %p91_p9 }
  0x1a   :  { %v28_v8 = vadd.f32 %v27_v6, %v26_v4  ;;  %v34_v9 = vadd.f32 %v33_v7, %v32_v5  ;;  %p94_p12 = pnand %p93_p11, %p87_p8 }
  0x1c   :  { %v29_v10 = vrot.slane %v28_v8, 1  ;;  %v35_v11 = vrot.slane %v34_v9, 1 }
  0x1e   :  { %v30_v12 = vadd.f32 %v29_v10, %v28_v8  ;;  %v36_v13 = vadd.f32 %v35_v11, %v34_v9 }
  0x20   :  { %v37_v14 = vmul.f32 0.125, %v30_v12  ;;  %v38_v15 = vmul.f32 0.125, %v36_v13 }
  0x22   :  { %v42_v16 = vsel %vm41_vm0, %v38_v15, %v37_v14 }
  0x23   :  { %44 = vst [vmem:[#allocation5] sm:$0x3] %v42_v16 }
  0x24   :  { %97 = shalt.err (!%p94_p12)
}
  0x25   :  { %s98_s24 = scalar_lea.hbm %s151_s1, 32 }
  0x26   :  { %p99_p13 = scmp.ne.s32.totalorder %s151_s1, %s98_s24  ;;  %p102_p0 = scmp.lt.u32.totalorder %s98_s24, %s151_s1 }
  0x28   :  { %p104_p1 = pnand %p102_p0, %p99_p13 }
  0x2a   :  { %107 = shalt.err (!%p104_p1)
}
  0x2b   :  { %54 = dma.vmem_to_hbm [thread:$0]  %s52_s21, 32, %s151_s1, [#allocation4]  }
  0x2c   :  { %110 = dma.done.wait [#allocation4], 32  }
  0x2d   :  { %111 = vsyncadd [#allocation4], 4294967264 }
  0x2e   :  { %58 = vsyncpa [#allocation3], 1 }
  0x2f   :  { %59 = vsyncpa [#allocation4], 1 }

</bundles_post_ra>
